<compile_context>
chip_gen: v7x
topology: tpu7x:2x2x1
jax: 0.10.0
libtpu: 0.0.40
codegen_flags: <defaults>
</compile_context>

<pallas_src>
import functools

import numpy as np
import jax
import jax.numpy as jnp
from jax.experimental import pallas as pl
from jax.experimental.pallas import tpu as pltpu


# MXU-native operand dtype (bf16 on v5e/v6e/v7x); accumulation stays f32.
_MXU_DTYPE = jnp.bfloat16


def _mm(a, b):
    """MXU matmul with bf16 operands and f32 accumulation."""
    return jnp.dot(a.astype(_MXU_DTYPE), b.astype(_MXU_DTYPE),
                   preferred_element_type=jnp.float32)


# ----------------------------------------------------------------------------
# Single fused kernel: one grid step == one batch element, everything in VMEM.
# ----------------------------------------------------------------------------
def _wam_kernel(x1_ref, x2_ref, x3_ref, xe_ref,
                up1_ref, up2_ref,
                p1_ref, p2_ref, p3_ref, b1rows_ref, po_ref,
                o_ref, *, c1, c2, c3, ce, c_mid, hw1, hw2, hw3):
    """Packed param buffers:
         p_i     : (Cm, Cin_i + 2*Cm + 2) = [w_conv | w_se1^T | w_se2 | b_conv | b_se2]
         b1rows  : (3, Cm)   row i = b_se1 of block i (kept as rows -> no transposes)
         po      : (Cout, Cm + Ce + 1) = [w_out_a | w_out_e | b_out]
       up1/up2   : dense separable-bilinear kron matrices (HW, 4*HW).
    """

    def weighted_block(x, p_ref, b1_row, c_in, hw):
        wc = p_ref[:, 0:c_in]                               # (Cm, Cin)
        w1t = p_ref[:, c_in:c_in + c_mid]                   # (Cm, Cm) == W_se1^T
        w2 = p_ref[:, c_in + c_mid:c_in + 2 * c_mid]        # (Cm, Cm)
        off = c_in + 2 * c_mid
        bc = p_ref[:, off:off + 1]                          # (Cm, 1)
        b2 = p_ref[:, off + 1:off + 2]                      # (Cm, 1)

        # 1x1 conv (BatchNorm folded) + ReLU on the MXU.
        y = jnp.maximum(_mm(wc, x) + bc, 0.0)               # (Cm, hw) f32

        # SE branch on the VPU/XLU only (GAP = lane reduce; FCs = bcast-mul + reduce).
        pooled = jnp.sum(y, axis=1, keepdims=True) * (1.0 / hw)            # (Cm, 1)
        h_row = jnp.maximum(
            jnp.sum(w1t * pooled, axis=0, keepdims=True) + b1_row, 0.0)    # (1, Cm)
        attn = jnp.sum(w2 * h_row, axis=1, keepdims=True) + b2             # (Cm, 1)
        return y * jax.nn.sigmoid(attn)                     # (Cm, hw)

    # Level 1: WB1(x_1) -> bilinear 2x upsample (single matmul, stays in VMEM).
    z1 = weighted_block(x1_ref[0], p1_ref, b1rows_ref[0:1, :], c1, hw1)
    r1 = _mm(z1, up1_ref[...])                              # (Cm, hw2)

    # Level 2: (up1 + WB2(x_2)) -> bilinear 2x upsample.
    z2 = r1 + weighted_block(x2_ref[0], p2_ref, b1rows_ref[1:2, :], c2, hw2)
    r2 = _mm(z2, up2_ref[...])                              # (Cm, hw3)

    # Level 3: up2 + WB3(x_3), then the final 1x1 output conv over
    # concat([., x_e], channel) as two split-weight matmuls (no concat in memory).
    z3 = r2 + weighted_block(x3_ref[0], p3_ref, b1rows_ref[2:3, :], c3, hw3)
    woa = po_ref[:, 0:c_mid]
    woe = po_ref[:, c_mid:c_mid + ce]
    bo = po_ref[:, c_mid + ce:c_mid + ce + 1]
    o_ref[0] = _mm(woa, z3) + _mm(woe, xe_ref[0]) + bo      # (Cout, hw3)


# ----------------------------------------------------------------------------
# Bilinear 2x upsample weights (align_corners=False, matches PyTorch nn.Upsample)
# ----------------------------------------------------------------------------
def _up_matrix_1d(n):
    """(2n, n) 1-D interpolation matrix, align_corners=False, edge clamped."""
    U = np.zeros((2 * n, n), dtype=np.float32)
    for o in range(2 * n):
        src = (o + 0.5) / 2.0 - 0.5
        i0 = int(np.floor(src))
        lam = src - i0
        i0c = min(max(i0, 0), n - 1)
        i1c = min(max(i0 + 1, 0), n - 1)
        U[o, i0c] += 1.0 - lam
        U[o, i1c] += lam
    return U


def _up_matrix_2d(h, w):
    """(h*w, 4*h*w) dense right-multiply matrix: out_flat = x_flat @ M."""
    return np.kron(_up_matrix_1d(h).T, _up_matrix_1d(w).T)


# ----------------------------------------------------------------------------
# Parameters (deterministic init; eval-mode BatchNorm folded into the 1x1 conv)
# ----------------------------------------------------------------------------
def init_weighted_block(key, c_in, c_out):
    k = jax.random.split(key, 6)
    w_conv = jax.random.normal(k[0], (c_out, c_in), jnp.float32) * 0.1
    b_conv = jax.random.normal(k[1], (c_out,), jnp.float32) * 0.05
    # BatchNorm (eval mode, default init): gamma=1, beta=0, mean=0, var=1.
    gamma = jnp.ones((c_out,), jnp.float32)
    beta = jnp.zeros((c_out,), jnp.float32)
    mean = jnp.zeros((c_out,), jnp.float32)
    var = jnp.ones((c_out,), jnp.float32)
    eps = 1e-5
    bn_scale = gamma / jnp.sqrt(var + eps)
    bn_shift = beta - mean * bn_scale
    return dict(
        w_conv=w_conv * bn_scale[:, None],
        b_conv=b_conv * bn_scale + bn_shift,
        w_se1=jax.random.normal(k[2], (c_out, c_out), jnp.float32) * 0.1,
        b_se1=jax.random.normal(k[3], (c_out,), jnp.float32) * 0.05,
        w_se2=jax.random.normal(k[4], (c_out, c_out), jnp.float32) * 0.1,
        b_se2=jax.random.normal(k[5], (c_out,), jnp.float32) * 0.05,
    )


def init_params(key, c1, c2, c3, ce, c_mid, c_out):
    k = jax.random.split(key, 6)
    return dict(
        wb1=init_weighted_block(k[0], c1, c_mid),
        wb2=init_weighted_block(k[1], c2, c_mid),
        wb3=init_weighted_block(k[2], c3, c_mid),
        w_out_a=jax.random.normal(k[3], (c_out, c_mid), jnp.float32) * 0.1,
        w_out_e=jax.random.normal(k[4], (c_out, ce), jnp.float32) * 0.1,
        b_out=jax.random.normal(k[5], (c_out,), jnp.float32) * 0.05,
    )


def _pack_block(p):
    """(Cm, Cin + 2*Cm + 2) = [w_conv | w_se1^T | w_se2 | b_conv | b_se2]."""
    c_mid = p["w_conv"].shape[0]
    return jnp.concatenate(
        [p["w_conv"], p["w_se1"].T, p["w_se2"],
         p["b_conv"].reshape(c_mid, 1), p["b_se2"].reshape(c_mid, 1)], axis=1)


# ----------------------------------------------------------------------------
# Forward (NCHW in / NCHW out; channels-first flat layout internally)
# ----------------------------------------------------------------------------
def weighted_aggregation_forward(params, x_1, x_2, x_3, x_e):
    B, C1, H1, W1 = x_1.shape
    _, C2, H2, W2 = x_2.shape
    _, C3, H3, W3 = x_3.shape
    _, CE, HE, WE = x_e.shape
    assert (2 * H1, 2 * W1) == (H2, W2) and (2 * H2, 2 * W2) == (H3, W3)
    assert (HE, WE) == (H3, W3)
    c_mid = params["wb1"]["w_conv"].shape[0]
    c_out = params["w_out_a"].shape[0]
    hw1, hw2, hw3 = H1 * W1, H2 * W2, H3 * W3

    # NCHW -> (B, C, H*W) is a free (layout-preserving) reshape.
    x1f = x_1.reshape(B, C1, hw1)
    x2f = x_2.reshape(B, C2, hw2)
    x3f = x_3.reshape(B, C3, hw3)
    xef = x_e.reshape(B, CE, hw3)

    # Dense bilinear-2x matrices (tiny at these resolutions; see module TODO for
    # the separable production path).
    up1 = jnp.asarray(_up_matrix_2d(H1, W1))                # (hw1, hw2)
    up2 = jnp.asarray(_up_matrix_2d(H2, W2))                # (hw2, hw3)
    assert up1.size * 4 <= (4 << 20) and up2.size * 4 <= (4 << 20), \
        "dense upsample matrix too large; switch to the separable two-pass form"

    # Packed parameter buffers (cuts 21 tiny DMAs to 5).
    p1 = _pack_block(params["wb1"])
    p2 = _pack_block(params["wb2"])
    p3 = _pack_block(params["wb3"])
    b1rows = jnp.stack([params["wb1"]["b_se1"], params["wb2"]["b_se1"],
                        params["wb3"]["b_se1"]], axis=0)    # (3, Cm)
    po = jnp.concatenate([params["w_out_a"], params["w_out_e"],
                          params["b_out"].reshape(c_out, 1)], axis=1)

    def batch_spec(c, hw):
        return pl.BlockSpec((1, c, hw), lambda b: (b, 0, 0))

    def const_spec(arr):
        nd = arr.ndim
        return pl.BlockSpec(arr.shape, lambda b: (0,) * nd)

    kernel = functools.partial(
        _wam_kernel, c1=C1, c2=C2, c3=C3, ce=CE, c_mid=c_mid,
        hw1=hw1, hw2=hw2, hw3=hw3)

    out = pl.pallas_call(
        kernel,
        out_shape=jax.ShapeDtypeStruct((B, c_out, hw3), jnp.float32),
        grid=(B,),
        in_specs=[batch_spec(C1, hw1), batch_spec(C2, hw2),
                  batch_spec(C3, hw3), batch_spec(CE, hw3),
                  const_spec(up1), const_spec(up2),
                  const_spec(p1), const_spec(p2), const_spec(p3),
                  const_spec(b1rows), const_spec(po)],
        out_specs=pl.BlockSpec((1, c_out, hw3), lambda b: (b, 0, 0)),
        compiler_params=pltpu.CompilerParams(
            dimension_semantics=("parallel",)),
    )(x1f, x2f, x3f, xef, up1, up2, p1, p2, p3, b1rows, po)

    return out.reshape(B, c_out, H3, W3)                    # NCHW


# ----------------------------------------------------------------------------
# Main
# ----------------------------------------------------------------------------
if __name__ == "__main__":
    # Synthetic config: Bottleneck.expansion = 4,
    # ARGS = {'decoder': [2, 2, 2], 'egm': [_, 2], 'wam': [2, 2]}
    EXP = 4
    C1 = C2 = C3 = 2 * EXP      # decoder channels * expansion = 8
    CE = 2 * EXP                # egm[1] * expansion = 8
    C_MID = 2 * EXP             # wam[0] * expansion = 8
    C_OUT = 2                   # wam[1]
    B = 2
    H1 = W1 = 4
    H2 = W2 = 8
    H3 = W3 = 16

    key = jax.random.PRNGKey(0)
    kp, k1, k2, k3, ke = jax.random.split(key, 5)
    params = init_params(kp, C1, C2, C3, CE, C_MID, C_OUT)

    x_1 = jax.random.normal(k1, (B, C1, H1, W1), jnp.float32)
    x_2 = jax.random.normal(k2, (B, C2, H2, W2), jnp.float32)
    x_3 = jax.random.normal(k3, (B, C3, H3, W3), jnp.float32)
    x_e = jax.random.normal(ke, (B, CE, H3, W3), jnp.float32)

    fwd = jax.jit(weighted_aggregation_forward)
    out = fwd(params, x_1, x_2, x_3, x_e)
    jax.block_until_ready(out)

    assert out.shape == (B, C_OUT, H3, W3), out.shape
    assert jnp.all(jnp.isfinite(out))
    print("KERNEL_OK")
</pallas_src>

<mosaic_0001>
module attributes {stable_mosaic.version = 11 : i64} {
  func.func @_wam_kernel(%arg0: i32, %arg1: memref<1x8x16xf32, #tpu.memory_space<vmem>>, %arg2: memref<1x8x64xf32, #tpu.memory_space<vmem>>, %arg3: memref<1x8x256xf32, #tpu.memory_space<vmem>>, %arg4: memref<1x8x256xf32, #tpu.memory_space<vmem>>, %arg5: memref<16x64xf32, #tpu.memory_space<vmem>>, %arg6: memref<64x256xf32, #tpu.memory_space<vmem>>, %arg7: memref<8x26xf32, #tpu.memory_space<vmem>>, %arg8: memref<8x26xf32, #tpu.memory_space<vmem>>, %arg9: memref<8x26xf32, #tpu.memory_space<vmem>>, %arg10: memref<3x8xf32, #tpu.memory_space<vmem>>, %arg11: memref<2x17xf32, #tpu.memory_space<vmem>>, %arg12: memref<1x2x256xf32, #tpu.memory_space<vmem>>) attributes {dimension_semantics = [#tpu.dimension_semantics<parallel>], iteration_bounds = array<i64: 2>, scalar_prefetch = 0 : i64, scratch_operands = 0 : i64, tpu.core_type = #tpu.core_type<tc>, window_params = [{transform_indices = @transform_0, window_bounds = array<i64: 1, 8, 16>}, {transform_indices = @transform_1, window_bounds = array<i64: 1, 8, 64>}, {transform_indices = @transform_2, window_bounds = array<i64: 1, 8, 256>}, {transform_indices = @transform_3, window_bounds = array<i64: 1, 8, 256>}, {pipeline_mode = #tpu.pipeline_mode<synchronous>, transform_indices = @transform_4, window_bounds = array<i64: 16, 64>}, {pipeline_mode = #tpu.pipeline_mode<synchronous>, transform_indices = @transform_5, window_bounds = array<i64: 64, 256>}, {pipeline_mode = #tpu.pipeline_mode<synchronous>, transform_indices = @transform_6, window_bounds = array<i64: 8, 26>}, {pipeline_mode = #tpu.pipeline_mode<synchronous>, transform_indices = @transform_7, window_bounds = array<i64: 8, 26>}, {pipeline_mode = #tpu.pipeline_mode<synchronous>, transform_indices = @transform_8, window_bounds = array<i64: 8, 26>}, {pipeline_mode = #tpu.pipeline_mode<synchronous>, transform_indices = @transform_9, window_bounds = array<i64: 3, 8>}, {pipeline_mode = #tpu.pipeline_mode<synchronous>, transform_indices = @transform_10, window_bounds = array<i64: 2, 17>}, {transform_indices = @transform_11, window_bounds = array<i64: 1, 2, 256>}]} {
    %c0 = arith.constant 0 : index
    %c0_0 = arith.constant 0 : index
    %c0_1 = arith.constant 0 : index
    %0 = vector.load %arg1[%c0, %c0_0, %c0_1] : memref<1x8x16xf32, #tpu.memory_space<vmem>>, vector<1x8x16xf32>
    %1 = vector.shape_cast %0 : vector<1x8x16xf32> to vector<8x16xf32>
    %c0_2 = arith.constant 0 : index
    %c0_3 = arith.constant 0 : index
    %2 = vector.load %arg10[%c0_2, %c0_3] : memref<3x8xf32, #tpu.memory_space<vmem>>, vector<1x8xf32>
    %c0_4 = arith.constant 0 : index
    %c0_5 = arith.constant 0 : index
    %3 = vector.load %arg7[%c0_4, %c0_5] : memref<8x26xf32, #tpu.memory_space<vmem>>, vector<8x8xf32>
    %c0_6 = arith.constant 0 : index
    %c8 = arith.constant 8 : index
    %4 = vector.load %arg7[%c0_6, %c8] : memref<8x26xf32, #tpu.memory_space<vmem>>, vector<8x8xf32>
    %c0_7 = arith.constant 0 : index
    %c16 = arith.constant 16 : index
    %5 = vector.load %arg7[%c0_7, %c16] : memref<8x26xf32, #tpu.memory_space<vmem>>, vector<8x8xf32>
    %c0_8 = arith.constant 0 : index
    %c24 = arith.constant 24 : index
    %6 = vector.load %arg7[%c0_8, %c24] : memref<8x26xf32, #tpu.memory_space<vmem>>, vector<8x1xf32>
    %c0_9 = arith.constant 0 : index
    %c25 = arith.constant 25 : index
    %7 = vector.load %arg7[%c0_9, %c25] : memref<8x26xf32, #tpu.memory_space<vmem>>, vector<8x1xf32>
    %8 = arith.truncf %3 : vector<8x8xf32> to vector<8x8xbf16>
    %9 = arith.truncf %1 : vector<8x16xf32> to vector<8x16xbf16>
    %cst = arith.constant dense<0.000000e+00> : vector<8x16xf32>
    %10 = tpu.matmul %8, %9, %cst {dimension_numbers = #tpu.dot_dimension_numbers<[1], [0], [0], [1], [0, 0, 1, 1], [], []>} : vector<8x8xbf16>, vector<8x16xbf16>, vector<8x16xf32> -> vector<8x16xf32>
    %11 = vector.broadcast %6 : vector<8x1xf32> to vector<8x16xf32>
    %12 = arith.addf %10, %11 : vector<8x16xf32>
    %cst_10 = arith.constant 0.000000e+00 : f32
    %13 = vector.broadcast %cst_10 : f32 to vector<8x16xf32>
    %14 = arith.maximumf %12, %13 : vector<8x16xf32>
    %cst_11 = arith.constant dense<0.000000e+00> : vector<8xf32>
    %15 = vector.multi_reduction <add>, %14, %cst_11 [1] : vector<8x16xf32> to vector<8xf32>
    %16 = vector.shape_cast %15 : vector<8xf32> to vector<8x1xf32>
    %cst_12 = arith.constant 6.250000e-02 : f32
    %17 = vector.broadcast %cst_12 : f32 to vector<8x1xf32>
    %18 = arith.mulf %16, %17 : vector<8x1xf32>
    %19 = vector.broadcast %18 : vector<8x1xf32> to vector<8x8xf32>
    %20 = arith.mulf %4, %19 : vector<8x8xf32>
    %cst_13 = arith.constant dense<0.000000e+00> : vector<8xf32>
    %21 = vector.multi_reduction <add>, %20, %cst_13 [0] : vector<8x8xf32> to vector<8xf32>
    %22 = vector.shape_cast %21 : vector<8xf32> to vector<1x8xf32>
    %23 = arith.addf %22, %2 : vector<1x8xf32>
    %cst_14 = arith.constant 0.000000e+00 : f32
    %24 = vector.broadcast %cst_14 : f32 to vector<1x8xf32>
    %25 = arith.maximumf %23, %24 : vector<1x8xf32>
    %26 = vector.broadcast %25 : vector<1x8xf32> to vector<8x8xf32>
    %27 = arith.mulf %5, %26 : vector<8x8xf32>
    %cst_15 = arith.constant dense<0.000000e+00> : vector<8xf32>
    %28 = vector.multi_reduction <add>, %27, %cst_15 [1] : vector<8x8xf32> to vector<8xf32>
    %29 = vector.shape_cast %28 : vector<8xf32> to vector<8x1xf32>
    %30 = arith.addf %29, %7 : vector<8x1xf32>
    %31 = arith.negf %30 : vector<8x1xf32>
    %32 = math.exp %31 : vector<8x1xf32>
    %cst_16 = arith.constant 1.000000e+00 : f32
    %33 = vector.broadcast %cst_16 : f32 to vector<8x1xf32>
    %34 = arith.addf %33, %32 : vector<8x1xf32>
    %35 = arith.divf %33, %34 : vector<8x1xf32>
    %36 = vector.broadcast %35 : vector<8x1xf32> to vector<8x16xf32>
    %37 = arith.mulf %14, %36 : vector<8x16xf32>
    %c0_17 = arith.constant 0 : index
    %c0_18 = arith.constant 0 : index
    %38 = vector.load %arg5[%c0_17, %c0_18] : memref<16x64xf32, #tpu.memory_space<vmem>>, vector<16x64xf32>
    %39 = arith.truncf %37 : vector<8x16xf32> to vector<8x16xbf16>
    %40 = arith.truncf %38 : vector<16x64xf32> to vector<16x64xbf16>
    %cst_19 = arith.constant dense<0.000000e+00> : vector<8x64xf32>
    %41 = tpu.matmul %39, %40, %cst_19 {dimension_numbers = #tpu.dot_dimension_numbers<[1], [0], [0], [1], [0, 0, 1, 1], [], []>} : vector<8x16xbf16>, vector<16x64xbf16>, vector<8x64xf32> -> vector<8x64xf32>
    %c0_20 = arith.constant 0 : index
    %c0_21 = arith.constant 0 : index
    %c0_22 = arith.constant 0 : index
    %42 = vector.load %arg2[%c0_20, %c0_21, %c0_22] : memref<1x8x64xf32, #tpu.memory_space<vmem>>, vector<1x8x64xf32>
    %43 = vector.shape_cast %42 : vector<1x8x64xf32> to vector<8x64xf32>
    %c1 = arith.constant 1 : index
    %c0_23 = arith.constant 0 : index
    %44 = vector.load %arg10[%c1, %c0_23] : memref<3x8xf32, #tpu.memory_space<vmem>>, vector<1x8xf32>
    %c0_24 = arith.constant 0 : index
    %c0_25 = arith.constant 0 : index
    %45 = vector.load %arg8[%c0_24, %c0_25] : memref<8x26xf32, #tpu.memory_space<vmem>>, vector<8x8xf32>
    %c0_26 = arith.constant 0 : index
    %c8_27 = arith.constant 8 : index
    %46 = vector.load %arg8[%c0_26, %c8_27] : memref<8x26xf32, #tpu.memory_space<vmem>>, vector<8x8xf32>
    %c0_28 = arith.constant 0 : index
    %c16_29 = arith.constant 16 : index
    %47 = vector.load %arg8[%c0_28, %c16_29] : memref<8x26xf32, #tpu.memory_space<vmem>>, vector<8x8xf32>
    %c0_30 = arith.constant 0 : index
    %c24_31 = arith.constant 24 : index
    %48 = vector.load %arg8[%c0_30, %c24_31] : memref<8x26xf32, #tpu.memory_space<vmem>>, vector<8x1xf32>
    %c0_32 = arith.constant 0 : index
    %c25_33 = arith.constant 25 : index
    %49 = vector.load %arg8[%c0_32, %c25_33] : memref<8x26xf32, #tpu.memory_space<vmem>>, vector<8x1xf32>
    %50 = arith.truncf %45 : vector<8x8xf32> to vector<8x8xbf16>
    %51 = arith.truncf %43 : vector<8x64xf32> to vector<8x64xbf16>
    %cst_34 = arith.constant dense<0.000000e+00> : vector<8x64xf32>
    %52 = tpu.matmul %50, %51, %cst_34 {dimension_numbers = #tpu.dot_dimension_numbers<[1], [0], [0], [1], [0, 0, 1, 1], [], []>} : vector<8x8xbf16>, vector<8x64xbf16>, vector<8x64xf32> -> vector<8x64xf32>
    %53 = vector.broadcast %48 : vector<8x1xf32> to vector<8x64xf32>
    %54 = arith.addf %52, %53 : vector<8x64xf32>
    %cst_35 = arith.constant 0.000000e+00 : f32
    %55 = vector.broadcast %cst_35 : f32 to vector<8x64xf32>
    %56 = arith.maximumf %54, %55 : vector<8x64xf32>
    %cst_36 = arith.constant dense<0.000000e+00> : vector<8xf32>
    %57 = vector.multi_reduction <add>, %56, %cst_36 [1] : vector<8x64xf32> to vector<8xf32>
    %58 = vector.shape_cast %57 : vector<8xf32> to vector<8x1xf32>
    %cst_37 = arith.constant 1.562500e-02 : f32
    %59 = vector.broadcast %cst_37 : f32 to vector<8x1xf32>
    %60 = arith.mulf %58, %59 : vector<8x1xf32>
    %61 = vector.broadcast %60 : vector<8x1xf32> to vector<8x8xf32>
    %62 = arith.mulf %46, %61 : vector<8x8xf32>
    %cst_38 = arith.constant dense<0.000000e+00> : vector<8xf32>
    %63 = vector.multi_reduction <add>, %62, %cst_38 [0] : vector<8x8xf32> to vector<8xf32>
    %64 = vector.shape_cast %63 : vector<8xf32> to vector<1x8xf32>
    %65 = arith.addf %64, %44 : vector<1x8xf32>
    %cst_39 = arith.constant 0.000000e+00 : f32
    %66 = vector.broadcast %cst_39 : f32 to vector<1x8xf32>
    %67 = arith.maximumf %65, %66 : vector<1x8xf32>
    %68 = vector.broadcast %67 : vector<1x8xf32> to vector<8x8xf32>
    %69 = arith.mulf %47, %68 : vector<8x8xf32>
    %cst_40 = arith.constant dense<0.000000e+00> : vector<8xf32>
    %70 = vector.multi_reduction <add>, %69, %cst_40 [1] : vector<8x8xf32> to vector<8xf32>
    %71 = vector.shape_cast %70 : vector<8xf32> to vector<8x1xf32>
    %72 = arith.addf %71, %49 : vector<8x1xf32>
    %73 = arith.negf %72 : vector<8x1xf32>
    %74 = math.exp %73 : vector<8x1xf32>
    %cst_41 = arith.constant 1.000000e+00 : f32
    %75 = vector.broadcast %cst_41 : f32 to vector<8x1xf32>
    %76 = arith.addf %75, %74 : vector<8x1xf32>
    %77 = arith.divf %75, %76 : vector<8x1xf32>
    %78 = vector.broadcast %77 : vector<8x1xf32> to vector<8x64xf32>
    %79 = arith.mulf %56, %78 : vector<8x64xf32>
    %80 = arith.addf %41, %79 : vector<8x64xf32>
    %c0_42 = arith.constant 0 : index
    %c0_43 = arith.constant 0 : index
    %81 = vector.load %arg6[%c0_42, %c0_43] : memref<64x256xf32, #tpu.memory_space<vmem>>, vector<64x256xf32>
    %82 = arith.truncf %80 : vector<8x64xf32> to vector<8x64xbf16>
    %83 = arith.truncf %81 : vector<64x256xf32> to vector<64x256xbf16>
    %cst_44 = arith.constant dense<0.000000e+00> : vector<8x256xf32>
    %84 = tpu.matmul %82, %83, %cst_44 {dimension_numbers = #tpu.dot_dimension_numbers<[1], [0], [0], [1], [0, 0, 1, 1], [], []>} : vector<8x64xbf16>, vector<64x256xbf16>, vector<8x256xf32> -> vector<8x256xf32>
    %c0_45 = arith.constant 0 : index
    %c0_46 = arith.constant 0 : index
    %c0_47 = arith.constant 0 : index
    %85 = vector.load %arg3[%c0_45, %c0_46, %c0_47] : memref<1x8x256xf32, #tpu.memory_space<vmem>>, vector<1x8x256xf32>
    %86 = vector.shape_cast %85 : vector<1x8x256xf32> to vector<8x256xf32>
    %c2 = arith.constant 2 : index
    %c0_48 = arith.constant 0 : index
    %87 = vector.load %arg10[%c2, %c0_48] : memref<3x8xf32, #tpu.memory_space<vmem>>, vector<1x8xf32>
    %c0_49 = arith.constant 0 : index
    %c0_50 = arith.constant 0 : index
    %88 = vector.load %arg9[%c0_49, %c0_50] : memref<8x26xf32, #tpu.memory_space<vmem>>, vector<8x8xf32>
    %c0_51 = arith.constant 0 : index
    %c8_52 = arith.constant 8 : index
    %89 = vector.load %arg9[%c0_51, %c8_52] : memref<8x26xf32, #tpu.memory_space<vmem>>, vector<8x8xf32>
    %c0_53 = arith.constant 0 : index
    %c16_54 = arith.constant 16 : index
    %90 = vector.load %arg9[%c0_53, %c16_54] : memref<8x26xf32, #tpu.memory_space<vmem>>, vector<8x8xf32>
    %c0_55 = arith.constant 0 : index
    %c24_56 = arith.constant 24 : index
    %91 = vector.load %arg9[%c0_55, %c24_56] : memref<8x26xf32, #tpu.memory_space<vmem>>, vector<8x1xf32>
    %c0_57 = arith.constant 0 : index
    %c25_58 = arith.constant 25 : index
    %92 = vector.load %arg9[%c0_57, %c25_58] : memref<8x26xf32, #tpu.memory_space<vmem>>, vector<8x1xf32>
    %93 = arith.truncf %88 : vector<8x8xf32> to vector<8x8xbf16>
    %94 = arith.truncf %86 : vector<8x256xf32> to vector<8x256xbf16>
    %cst_59 = arith.constant dense<0.000000e+00> : vector<8x256xf32>
    %95 = tpu.matmul %93, %94, %cst_59 {dimension_numbers = #tpu.dot_dimension_numbers<[1], [0], [0], [1], [0, 0, 1, 1], [], []>} : vector<8x8xbf16>, vector<8x256xbf16>, vector<8x256xf32> -> vector<8x256xf32>
    %96 = vector.broadcast %91 : vector<8x1xf32> to vector<8x256xf32>
    %97 = arith.addf %95, %96 : vector<8x256xf32>
    %cst_60 = arith.constant 0.000000e+00 : f32
    %98 = vector.broadcast %cst_60 : f32 to vector<8x256xf32>
    %99 = arith.maximumf %97, %98 : vector<8x256xf32>
    %cst_61 = arith.constant dense<0.000000e+00> : vector<8xf32>
    %100 = vector.multi_reduction <add>, %99, %cst_61 [1] : vector<8x256xf32> to vector<8xf32>
    %101 = vector.shape_cast %100 : vector<8xf32> to vector<8x1xf32>
    %cst_62 = arith.constant 3.906250e-03 : f32
    %102 = vector.broadcast %cst_62 : f32 to vector<8x1xf32>
    %103 = arith.mulf %101, %102 : vector<8x1xf32>
    %104 = vector.broadcast %103 : vector<8x1xf32> to vector<8x8xf32>
    %105 = arith.mulf %89, %104 : vector<8x8xf32>
    %cst_63 = arith.constant dense<0.000000e+00> : vector<8xf32>
    %106 = vector.multi_reduction <add>, %105, %cst_63 [0] : vector<8x8xf32> to vector<8xf32>
    %107 = vector.shape_cast %106 : vector<8xf32> to vector<1x8xf32>
    %108 = arith.addf %107, %87 : vector<1x8xf32>
    %cst_64 = arith.constant 0.000000e+00 : f32
    %109 = vector.broadcast %cst_64 : f32 to vector<1x8xf32>
    %110 = arith.maximumf %108, %109 : vector<1x8xf32>
    %111 = vector.broadcast %110 : vector<1x8xf32> to vector<8x8xf32>
    %112 = arith.mulf %90, %111 : vector<8x8xf32>
    %cst_65 = arith.constant dense<0.000000e+00> : vector<8xf32>
    %113 = vector.multi_reduction <add>, %112, %cst_65 [1] : vector<8x8xf32> to vector<8xf32>
    %114 = vector.shape_cast %113 : vector<8xf32> to vector<8x1xf32>
    %115 = arith.addf %114, %92 : vector<8x1xf32>
    %116 = arith.negf %115 : vector<8x1xf32>
    %117 = math.exp %116 : vector<8x1xf32>
    %cst_66 = arith.constant 1.000000e+00 : f32
    %118 = vector.broadcast %cst_66 : f32 to vector<8x1xf32>
    %119 = arith.addf %118, %117 : vector<8x1xf32>
    %120 = arith.divf %118, %119 : vector<8x1xf32>
    %121 = vector.broadcast %120 : vector<8x1xf32> to vector<8x256xf32>
    %122 = arith.mulf %99, %121 : vector<8x256xf32>
    %123 = arith.addf %84, %122 : vector<8x256xf32>
    %c0_67 = arith.constant 0 : index
    %c0_68 = arith.constant 0 : index
    %124 = vector.load %arg11[%c0_67, %c0_68] : memref<2x17xf32, #tpu.memory_space<vmem>>, vector<2x8xf32>
    %c0_69 = arith.constant 0 : index
    %c8_70 = arith.constant 8 : index
    %125 = vector.load %arg11[%c0_69, %c8_70] : memref<2x17xf32, #tpu.memory_space<vmem>>, vector<2x8xf32>
    %c0_71 = arith.constant 0 : index
    %c16_72 = arith.constant 16 : index
    %126 = vector.load %arg11[%c0_71, %c16_72] : memref<2x17xf32, #tpu.memory_space<vmem>>, vector<2x1xf32>
    %127 = arith.truncf %124 : vector<2x8xf32> to vector<2x8xbf16>
    %128 = arith.truncf %123 : vector<8x256xf32> to vector<8x256xbf16>
    %cst_73 = arith.constant dense<0.000000e+00> : vector<2x256xf32>
    %129 = tpu.matmul %127, %128, %cst_73 {dimension_numbers = #tpu.dot_dimension_numbers<[1], [0], [0], [1], [0, 0, 1, 1], [], []>} : vector<2x8xbf16>, vector<8x256xbf16>, vector<2x256xf32> -> vector<2x256xf32>
    %c0_74 = arith.constant 0 : index
    %c0_75 = arith.constant 0 : index
    %c0_76 = arith.constant 0 : index
    %130 = vector.load %arg4[%c0_74, %c0_75, %c0_76] : memref<1x8x256xf32, #tpu.memory_space<vmem>>, vector<1x8x256xf32>
    %131 = vector.shape_cast %130 : vector<1x8x256xf32> to vector<8x256xf32>
    %132 = arith.truncf %125 : vector<2x8xf32> to vector<2x8xbf16>
    %133 = arith.truncf %131 : vector<8x256xf32> to vector<8x256xbf16>
    %cst_77 = arith.constant dense<0.000000e+00> : vector<2x256xf32>
    %134 = tpu.matmul %132, %133, %cst_77 {dimension_numbers = #tpu.dot_dimension_numbers<[1], [0], [0], [1], [0, 0, 1, 1], [], []>} : vector<2x8xbf16>, vector<8x256xbf16>, vector<2x256xf32> -> vector<2x256xf32>
    %135 = arith.addf %129, %134 : vector<2x256xf32>
    %136 = vector.broadcast %126 : vector<2x1xf32> to vector<2x256xf32>
    %137 = arith.addf %135, %136 : vector<2x256xf32>
    %c0_78 = arith.constant 0 : index
    %c0_79 = arith.constant 0 : index
    %c0_80 = arith.constant 0 : index
    %138 = vector.load %arg12[%c0_78, %c0_79, %c0_80] : memref<1x2x256xf32, #tpu.memory_space<vmem>>, vector<1x2x256xf32>
    %139 = vector.shape_cast %138 : vector<1x2x256xf32> to vector<2x256xf32>
    %140 = vector.shape_cast %137 : vector<2x256xf32> to vector<1x2x256xf32>
    tpu.vector_store %arg12[%c0_78, %c0_79, %c0_80], %140 {strides = array<i32>} : memref<1x2x256xf32, #tpu.memory_space<vmem>>, vector<1x2x256xf32>,
    return
  }
  func.func @transform_0(%arg0: i32) -> (i32, i32, i32) {
    %c0_i32 = arith.constant 0 : i32
    %c0_i32_0 = arith.constant 0 : i32
    %c0_i32_1 = arith.constant 0 : i32
    return %arg0, %c0_i32, %c0_i32_0 : i32, i32, i32
  }
  func.func @transform_1(%arg0: i32) -> (i32, i32, i32) {
    %c0_i32 = arith.constant 0 : i32
    %c0_i32_0 = arith.constant 0 : i32
    %c0_i32_1 = arith.constant 0 : i32
    return %arg0, %c0_i32, %c0_i32_0 : i32, i32, i32
  }
  func.func @transform_2(%arg0: i32) -> (i32, i32, i32) {
    %c0_i32 = arith.constant 0 : i32
    %c0_i32_0 = arith.constant 0 : i32
    %c0_i32_1 = arith.constant 0 : i32
    return %arg0, %c0_i32, %c0_i32_0 : i32, i32, i32
  }
  func.func @transform_3(%arg0: i32) -> (i32, i32, i32) {
    %c0_i32 = arith.constant 0 : i32
    %c0_i32_0 = arith.constant 0 : i32
    %c0_i32_1 = arith.constant 0 : i32
    return %arg0, %c0_i32, %c0_i32_0 : i32, i32, i32
  }
  func.func @transform_4(%arg0: i32) -> (i32, i32) {
    %c0_i32 = arith.constant 0 : i32
    %c0_i32_0 = arith.constant 0 : i32
    %c0_i32_1 = arith.constant 0 : i32
    return %c0_i32, %c0_i32_0 : i32, i32
  }
  func.func @transform_5(%arg0: i32) -> (i32, i32) {
    %c0_i32 = arith.constant 0 : i32
    %c0_i32_0 = arith.constant 0 : i32
    %c0_i32_1 = arith.constant 0 : i32
    return %c0_i32, %c0_i32_0 : i32, i32
  }
  func.func @transform_6(%arg0: i32) -> (i32, i32) {
    %c0_i32 = arith.constant 0 : i32
    %c0_i32_0 = arith.constant 0 : i32
    %c0_i32_1 = arith.constant 0 : i32
    return %c0_i32, %c0_i32_0 : i32, i32
  }
  func.func @transform_7(%arg0: i32) -> (i32, i32) {
    %c0_i32 = arith.constant 0 : i32
    %c0_i32_0 = arith.constant 0 : i32
    %c0_i32_1 = arith.constant 0 : i32
    return %c0_i32, %c0_i32_0 : i32, i32
  }
  func.func @transform_8(%arg0: i32) -> (i32, i32) {
    %c0_i32 = arith.constant 0 : i32
    %c0_i32_0 = arith.constant 0 : i32
    %c0_i32_1 = arith.constant 0 : i32
    return %c0_i32, %c0_i32_0 : i32, i32
  }
  func.func @transform_9(%arg0: i32) -> (i32, i32) {
    %c0_i32 = arith.constant 0 : i32
    %c0_i32_0 = arith.constant 0 : i32
    %c0_i32_1 = arith.constant 0 : i32
    return %c0_i32, %c0_i32_0 : i32, i32
  }
  func.func @transform_10(%arg0: i32) -> (i32, i32) {
    %c0_i32 = arith.constant 0 : i32
    %c0_i32_0 = arith.constant 0 : i32
    %c0_i32_1 = arith.constant 0 : i32
    return %c0_i32, %c0_i32_0 : i32, i32
  }
  func.func @transform_11(%arg0: i32) -> (i32, i32, i32) {
    %c0_i32 = arith.constant 0 : i32
    %c0_i32_0 = arith.constant 0 : i32
    %c0_i32_1 = arith.constant 0 : i32
    return %arg0, %c0_i32, %c0_i32_0 : i32, i32, i32
  }
}

</mosaic_0001>

<bundles_post_ra>
// kernel: weighted_aggregation_forward.1
= control target key start
LH: loop header
LB: loop body
LE: loop exit
PB: predicated region body
PF: predicated region fallthrough
CT: control target
= control target key end

     0   :  { %s1273_s17 = smov 0   ;;  %s1482_s0 = inlined_call_operand.vmem [shape: f32[2,8,16], index: 0, kind: input, shape index: {}]   ;;  %s1483_s1 = inlined_call_operand.vmem [shape: f32[2,8,64], index: 1, kind: input, shape index: {}]   ;;  %s1484_s2 = inlined_call_operand.vmem [shape: f32[2,8,256], index: 2, kind: input, shape index: {}]   ;;  %s1485_s3 = inlined_call_operand.vmem [shape: f32[2,8,256], index: 3, kind: input, shape index: {}]   ;;  %s1486_s4 = inlined_call_operand.vmem [shape: f32[16,64], index: 4, kind: input, shape index: {}]   ;;  %s1487_s5 = inlined_call_operand.vmem [shape: f32[64,256], index: 5, kind: input, shape index: {}]   ;;  %s1488_s6 = inlined_call_operand.vmem [shape: f32[8,26], index: 6, kind: input, shape index: {}]   ;;  %s1489_s7 = inlined_call_operand.vmem [shape: f32[8,26], index: 7, kind: input, shape index: {}]   ;;  %s1490_s8 = inlined_call_operand.vmem [shape: f32[8,26], index: 8, kind: input, shape index: {}]   ;;  %s1491_s9 = inlined_call_operand.vmem [shape: f32[3,8], index: 9, kind: input, shape index: {}]   ;;  %s1492_s10 = inlined_call_operand.vmem [shape: f32[2,17], index: 10, kind: input, shape index: {}]   ;;  %s1493_s11 = inlined_call_operand.vmem [shape: f32[2,2,256], index: 11, kind: output, shape index: {}]  }
   0x1 LB: > { %s1104_s18 = sadd.s32 4294967295, %s1202_s17   ;;  %p1108_p0 = scmp.ge.s32.totalorder %s1202_s17, 1  ;;  %s1202_s17 = sphi %s1273_s17, %s21_s17  }
   0x2   : > { %p365_p1 = scmp.lt.s32.totalorder %s1202_s17, 3 }
   0x4   : > { %p366_p2 = pnand %p1108_p0, %p365_p1 }
   0x5   : > { %p418_p3 = scmp.lt.s32.totalorder (!%p366_p2), %s1104_s18, 1  ;;  %v1204_v0 = vmov (!%p366_p2), 0.0   ;;  %vm1205_vm0 = vmmov (!%p366_p2), 0   ;;  %v1287_v1 = vld [vmem:[%s1488_s6] sm:$0xff] (!%p366_p2)  ;;  %v1206_v2 = vmov (!%p366_p2), 24   ;;  %vm456_vm1 = vcmask (!%p366_p2), 1043456  }
   0x6   : > { %369 = sbr.rel (%p366_p2) target bundleno = 1875 (0x753), region = 64  ;;  %1142 = vmatprep.subr.bf16.mxu0 (!%p366_p2), %v1204_v0  ;;  %1144 = vmatprep.mubr.msk.bf16.mxu0 (!%p366_p2), %vm1205_vm0, %v1204_v0  ;;  %v445_v6 = vpack.c.bf16 (!%p366_p2), %v1287_v1, %v1287_v1  ;;  %vm452_vm2 = vcmask (!%p366_p2), 64512   ;;  %v443_v7 = vld [vmem:[%s1491_s9] sm:$0x1] (!%p366_p2)  ;;  %s1207_s30 = smov (!%p366_p2), 8   ;;  %vm501_vm3 = vcmask (!%p366_p2), 130048   ;;  %v521_v27 = vlaneseq (!%p366_p2) }
   0x7   : > { %1177 = vset.pattern.permute.xlu0 (!%p366_p2), %v1206_v2  ;;  %1148 = vmatprep.subr.bf16.mxu1 (!%p366_p2), %v1204_v0  ;;  %v1312_v9 = vld [vmem:[%s1489_s7] sm:$0xff] (!%p366_p2)  ;;  %vm507_vm4 = vcmask (!%p366_p2), 130112   ;;  %s1208_s14 = smov (!%p366_p2), 112   ;;  %vm611_vm5 = vcmask (!%p366_p2), 523264   ;;  %v1209_v49 = vmov (!%p366_p2), 0   ;;  %v1210_v59 = vmov (!%p366_p2), 25  }
   0x8   : > { %449 = vperm.xlu0 (!%p366_p2), %1177, %v1287_v1   ;;  %1150 = vmatprep.mubr.msk.bf16.mxu1 (!%p366_p2), %vm1205_vm0, %v1204_v0  ;;  %v557_v12 = vpack.c.bf16 (!%p366_p2), %v1312_v9, %v1312_v9  ;;  %v522_v31 = vshrl.u32 (!%p366_p2), %v521_v27, 7  ;;  %v555_v48 = vld [vmem:[%s1491_s9 + $0x1] sm:$0x1] (!%p366_p2)  ;;  %s1211_s23 = smov (!%p366_p2), 120  }
   0x9   : > { %1178 = vset.pattern.permute.xlu1 (!%p366_p2), %v1206_v2  ;;  %v1353_v52 = vld [vmem:[%s1490_s8] sm:$0xff] (!%p366_p2) }
   0xa   : > { %516 = vrot.lane.b32.xlu1 (!%p366_p2), %v443_v7, %s1207_s30  ;;  %v1326_v38 = vsub.s32 (!%p366_p2), 0, %v522_v31  ;;  %v731_v56 = vpack.c.bf16 (!%p366_p2), %v1353_v52, %v1353_v52 }
   0xc   : > { %1179 = vset.pattern.permute.xlu0 (!%p366_p2), %v1210_v59 }
   0xd   : > { %s1495_s18 = smov (!%p418_p3, %s1104_s18), 1 }
   0xe   : > { %s1109_s21 = sshll.u32 %s1495_s18, 3  ;;  %s1133_s19 = sshll.u32 %s1495_s18, 4 }
   0xf   : > { %s421_s24 = scalar_lea.vmem %s1482_s0, %s1109_s21  ;;  %s425_s29 = scalar_lea.vmem %s1483_s1, %s1109_s21 }
  0x10   : > { %v442_v3 = vld [vmem:[%s421_s24] sm:$0xff]  ;;  %s430_s22 = scalar_lea.vmem %s1484_s2, %s1133_s19  ;;  %s1135_s24 = sshll.u32 %s1495_s18, 2 }
  0x11   : > { %v446_v4 = vpack.c.bf16 %v442_v3, %v442_v3  ;;  %v554_v8 = vld [vmem:[%s425_s29] sm:$0xff]  ;;  %v728_v50 = vld [vmem:[%s430_s22 + $0x8] sm:$0xff]  ;;  %s440_s27 = scalar_lea.vmem %s1493_s11, %s1135_s24 }
  0x12   : > { %v558_v10 = vpack.c.bf16 %v554_v8, %v554_v8  ;;  %v727_v51 = vld [vmem:[%s430_s22] sm:$0xff]  ;;  %v733_v53 = vpack.c.bf16 %v728_v50, %v728_v50  ;;  %s435_s22 = scalar_lea.vmem %s1485_s3, %s1133_s19 }
  0x13   : > { %v458_v5 = vsel %vm456_vm1, %v446_v4, 0  ;;  %v732_v54 = vpack.c.bf16 %v727_v51, %v727_v51 }
  0x14   : > { %1143 = vmatpush3.bf16.msra.mxu0 %v458_v5  ;;  %v568_v11 = vsel %vm456_vm1, %v558_v10, 0 }
  0x15   : > { %1154 = vmatprep.subr.bf16.mxu0 %v1204_v0  ;;  %1149 = vmatpush3.bf16.msra.mxu1 %v568_v11  ;;  %v743_v55 = vsel %vm456_vm1, %v732_v54, 0 }
  0x16   : > { %1122 = vmatprep.subr.msk.bf16.mxu1 %vm456_vm1, %v733_v53 }
  0x17   : > { %1145 = vmatmul.mubr.msk.bf16.vlgmr.msra.gmra.mrb[0].mxu0 %vm452_vm2, %v445_v6 }
  0x18   : > { %1156 = vmatprep.mubr.msk.bf16.mxu0 %vm1205_vm0, %v1204_v0  ;;  %1151 = vmatmul.mubr.msk.bf16.vlgmr.msra.gmra.mrb[0].mxu1 %vm452_vm2, %v557_v12 }
  0x19   : > { %780 = vmatprep.mubr.bf16.mxu1 %v1209_v49  ;;  %749 = vmatpush1.bf16.msra.mxu1 %v743_v55 }
  0x20   : > { %1123 = vmatmul.mubr.msk.bf16.vlgmr.msra.gmra.mrb[4].mxu1 %vm452_vm2, %v731_v56  ;;  %v703_v56 = vld [vmem:[%s1487_s5 + $0x8] sm:$0xff] }
  0x21   : > { %935 = vmatprep.mubr.bf16.mxu1 %v1209_v49 }
  0x7c   : > { %v517_v34 = vpop.permute.xlu1 %516 }
  0x87   : > { %v450_v13 = vpop.permute.xlu0 %449 }
  0xea   : > { %v494_v14 = vpop.f32.mrb[0].mxu0 }
  0xeb   : > { %v1318_v15 = vadd.f32 %v494_v14, %v450_v13  ;;  %v1146_v16 = vpop.f32.mrb[1].mxu0  ;;  %v604_v30 = vpop.f32.mrb[0].mxu1 }
  0xec   : > { %v497_v17 = vpop.f32.mrb[2].mxu0  ;;  %v1152_v33 = vpop.f32.mrb[1].mxu1 }
  0xed   : > { %v500_v18 = vmax.f32 %v1318_v15, 0.0  ;;  %v1147_v19 = vpop.f32.mrb[3].mxu0  ;;  %v607_v35 = vpop.f32.mrb[2].mxu1 }
  0xee   : > { %v1153_v37 = vpop.f32.mrb[3].mxu1 }
  0xef   : > { %v502_v20 = vsel %vm501_vm3, %v500_v18, 0.0 }
  0xf0   : > { %503 = vadd.xlane.f32.xlu0 %v502_v20  ;;  %v550_v20 = vld [vmem:[%s1486_s4] sm:$0xff] }
 0x17d   : > { %v504_v21 = vpop.xlane.xlu0 %503 }
 0x17e   : > { %v505_v22 = vmul.f32 0.0625, %v504_v21  ;;  %v551_v21 = vld [vmem:[%s1486_s4 + $0x8] sm:$0xff] }
 0x180   : > { %v506_v23 = vmul.f32 %v505_v22, %v1287_v1 }
 0x182   : > { %v508_v24 = vsel %vm507_vm4, %v506_v23, 0.0  ;;  %v553_v23 = vpack.c.bf16 %v551_v21, %v550_v20  ;;  %v715_v21 = vld [vmem:[%s1487_s5 + $0x68] sm:$0xff] }
 0x183   : > { %v509_v25 = vrot.slane %v508_v24, 4 }
 0x184   : > { %1155 = vmatpush3.bf16.msra.mxu0 %v553_v23 }
 0x185   : > { %v510_v26 = vadd.f32 %v509_v25, %v508_v24  ;;  %v782_v24 = vpop.f32.mrb[4].mxu1 }
 0x186   : > { %v784_v25 = vpop.f32.mrb[5].mxu1 }
 0x187   : > { %v511_v28 = vrot.slane %v510_v26, 2 }
 0x189   : > { %v512_v29 = vadd.f32 %v511_v28, %v510_v26 }
 0x18b   : > { %v513_v32 = vrot.slane %v512_v29, 1 }
 0x18d   : > { %v514_v36 = vadd.f32 %v513_v32, %v512_v29 }
 0x18f   : > { %v519_v39 = vadd.f32 %v517_v34, %v514_v36 }
 0x191   : > { %v520_v40 = vmax.f32 %v519_v39, 0.0 }
 0x193   : > { %v524_v41 = vrot.slane %v520_v40, %v1326_v38 }
 0x195   : > { %526 = vrot.lane.b32.xlu1 %v524_v41, %s1207_s30 }
 0x199   : > { %561 = vperm.xlu1 %1178, %v1312_v9  }
 0x19d   : > { %1181 = vset.pattern.permute.xlu1 %v1210_v59 }
 0x207   : > { %v527_v42 = vpop.permute.xlu1 %526 }
 0x208   : > { %v529_v43 = vmul.f32 %v527_v42, %v1287_v1 }
 0x20a   : > { %531 = vrot.lane.b32.xlu1 %v529_v43, %s1208_s14 }
 0x218   : > { %v562_v44 = vpop.permute.xlu1 %561 }
 0x219   : > { %v1333_v45 = vadd.f32 %v604_v30, %v562_v44 }
 0x21b   : > { %v610_v46 = vmax.f32 %v1333_v45, 0.0 }
 0x21d   : > { %v612_v47 = vsel %vm611_vm5, %v610_v46, 0.0 }
 0x21e   : > { %613 = vadd.xlane.f32.xlu0 %v612_v47 }
 0x234   : > { %625 = vrot.lane.b32.xlu0 %v555_v48, %s1207_s30 }
 0x27c   : > { %v532_v57 = vpop.permute.xlu1 %531 }
 0x27d   : > { %v534_v58 = vsel %vm452_vm2, %v532_v57, 0.0  ;;  %v702_v57 = vld [vmem:[%s1487_s5] sm:$0xff] }
 0x27e   : > { %535 = vadd.xlane.f32.xlu1 %v534_v58 }
 0x2ab   : > { %v614_v60 = vpop.xlane.xlu0 %613 }
 0x2ac   : > { %v615_v61 = vmul.f32 0.015625, %v614_v60  ;;  %v704_v60 = vld [vmem:[%s1487_s5 + $0x10] sm:$0xff] }
 0x2ae   : > { %v616_v62 = vmul.f32 %v615_v61, %v1312_v9  ;;  %v707_v61 = vld [vmem:[%s1487_s5 + $0x28] sm:$0xff] }
 0x2af   : > { %v626_v7 = vpop.permute.xlu0 %625 }
 0x2b0   : > { %v617_v63 = vsel %vm507_vm4, %v616_v62, 0.0  ;;  %v709_v62 = vld [vmem:[%s1487_s5 + $0x38] sm:$0xff] }
 0x2b1   : > { %v618_v0 = vrot.slane %v617_v63, 4 }
 0x2b3   : > { %v619_v3 = vadd.f32 %v618_v0, %v617_v63  ;;  %v719_v0 = vpack.c.bf16 %v704_v60, %v702_v57  ;;  %v1212_v57 = vmov 16  }
 0x2b5   : > { %v620_v4 = vrot.slane %v619_v3, 2 }
 0x2b7   : > { %v621_v5 = vadd.f32 %v620_v4, %v619_v3  ;;  %v722_v3 = vpack.c.bf16 %v709_v62, %v707_v61  ;;  %v706_v4 = vld [vmem:[%s1487_s5 + $0x20] sm:$0xff] }
 0x2b9   : > { %v622_v6 = vrot.slane %v621_v5, 1 }
 0x2bb   : > { %v623_v8 = vadd.f32 %v622_v6, %v621_v5  ;;  %v708_v5 = vld [vmem:[%s1487_s5 + $0x30] sm:$0xff]  ;;  %v711_v6 = vld [vmem:[%s1487_s5 + $0x48] sm:$0xff] }
 0x2bd   : > { %v628_v10 = vadd.f32 %v626_v7, %v623_v8  ;;  %v713_v8 = vld [vmem:[%s1487_s5 + $0x58] sm:$0xff] }
 0x2bf   : > { %v629_v11 = vmax.f32 %v628_v10, 0.0  ;;  %v721_v10 = vpack.c.bf16 %v708_v5, %v706_v4 }
 0x2c1   : > { %v633_v12 = vrot.slane %v629_v11, %v1326_v38 }
 0x2c3   : > { %635 = vrot.lane.b32.xlu1 %v633_v12, %s1207_s30  ;;  %v724_v12 = vpack.c.bf16 %v713_v8, %v711_v6 }
 0x30b   : > { %v536_v13 = vpop.xlane.xlu1 %535 }
 0x30c   : > { %v537_v14 = vadd.f32 %v536_v13, %v1287_v1  ;;  %v786_v1 = vpop.f32.mrb[6].mxu1  ;;  %v710_v13 = vld [vmem:[%s1487_s5 + $0x40] sm:$0xff] }
 0x30d   : > { %v787_v26 = vpop.f32.mrb[7].mxu1 }
 0x30e   : > { %v1118_v16 = vmul.f32 -1.442695, %v537_v14  ;;  %v712_v14 = vld [vmem:[%s1487_s5 + $0x50] sm:$0xff] }
 0x310   : > { %1184 = vpow2.f32 %v1118_v16 }
 0x31a   : > { %v1185_v17 = vpop.eup %1184 }
 0x31b   : > { %v541_v19 = vadd.f32 1.0, %v1185_v17  ;;  %v723_v17 = vpack.c.bf16 %v712_v14, %v710_v13 }
 0x31d   : > { %1186 = vrcp.f32 %v541_v19 }
 0x327   : > { %v1187_v22 = vpop.eup %1186 }
 0x328   : > { %546 = vperm.xlu0 %1179, %v1187_v22   ;;  %v717_v22 = vld [vmem:[%s1487_s5 + $0x78] sm:$0xff] }
 0x329   : > { %v726_v23 = vpack.c.bf16 %v717_v22, %v715_v21 }
 0x32c   : > { %1180 = vset.pattern.permute.xlu0 %v1206_v2 }
 0x32d   : > { %736 = vperm.xlu0 %1180, %v1353_v52  }
 0x331   : > { %1182 = vset.pattern.permute.xlu0 %v1210_v59 }
 0x335   : > { %v636_v27 = vpop.permute.xlu1 %635 }
 0x336   : > { %v638_v28 = vmul.f32 %v636_v27, %v1312_v9 }
 0x338   : > { %640 = vrot.lane.b32.xlu1 %v638_v28, %s1208_s14 }
 0x3a7   : > { %v547_v29 = vpop.permute.xlu0 %546 }
 0x3a8   : > { %v549_v30 = vmul.f32 %v547_v29, %v500_v18  ;;  %v729_v18 = vld [vmem:[%s1491_s9 + $0x2] sm:$0x1] }
 0x3aa   : > { %v552_v31 = vpack.c.bf16 %v549_v30, %v549_v30  ;;  %v641_v32 = vpop.permute.xlu1 %640 }
 0x3ab   : > { %v643_v33 = vsel %vm452_vm2, %v641_v32, 0.0 }
 0x3ac   : > { %1157 = vmatmul.mubr.msk.bf16.vlgmr.msra.gmra.mrb[4].mxu0 %vm501_vm3, %v552_v31  ;;  %v737_v34 = vpop.permute.xlu0 %736  ;;  %644 = vadd.xlane.f32.xlu1 %v643_v33 }
 0x3ad   : > { %v1381_v2 = vadd.f32 %v782_v24, %v737_v34  ;;  %v1383_v35 = vadd.f32 %v784_v25, %v737_v34  ;;  %874 = vmatprep.mubr.bf16.mxu0 %v1209_v49  ;;  %v714_v24 = vld [vmem:[%s1487_s5 + $0x60] sm:$0xff] }
 0x3af   : > { %v789_v36 = vmax.f32 %v1381_v2, 0.0  ;;  %v790_v37 = vmax.f32 %v1383_v35, 0.0 }
 0x3b1   : > { %v791_v15 = vadd.f32 %v790_v37, %v789_v36 }
 0x3b3   : > { %792 = vadd.xlane.f32.xlu0 %v791_v15 }
 0x3c9   : > { %804 = vrot.lane.b32.xlu0 %v729_v18, %s1207_s30 }
 0x439   : > { %v645_v39 = vpop.xlane.xlu1 %644 }
 0x43a   : > { %v646_v40 = vadd.f32 %v645_v39, %v1312_v9  ;;  %v705_v9 = vld [vmem:[%s1487_s5 + $0x18] sm:$0xff]  ;;  %v888_v39 = vld [vmem:[%s435_s22 + $0x8] sm:$0xff] }
 0x43b   : > { %v720_v59 = vpack.c.bf16 %v705_v9, %v703_v56 }
 0x43c   : > { %v1120_v41 = vmul.f32 -1.442695, %v646_v40  ;;  %v887_v40 = vld [vmem:[%s435_s22] sm:$0xff] }
 0x43d   : > { %842 = vmatprep.subr.bf16.mxu0 %v720_v59 }
 0x43e   : > { %1188 = vpow2.f32 %v1120_v41  ;;  %843 = vmatpush1.bf16.msra.mxu0 %v719_v0  ;;  %v890_v41 = vpack.c.bf16 %v888_v39, %v888_v39 }
 0x43f   : > { %844 = vmatprep.subr.bf16.mxu0 %v722_v3 }
 0x440   : > { %v793_v42 = vpop.xlane.xlu0 %792  ;;  %1126 = vmatprep.subr.msk.bf16.mxu1 %vm456_vm1, %v890_v41 }
 0x441   : > { %v794_v43 = vmul.f32 0.00390625, %v793_v42  ;;  %v889_v42 = vpack.c.bf16 %v887_v40, %v887_v40 }
 0x442   : > { %845 = vmatpush1.bf16.msra.mxu0 %v721_v10 }
 0x443   : > { %v795_v44 = vmul.f32 %v794_v43, %v1353_v52  ;;  %846 = vmatprep.subr.bf16.mxu0 %v724_v12  ;;  %v898_v45 = vsel %vm456_vm1, %v889_v42, 0 }
 0x444   : > { %v805_v63 = vpop.permute.xlu0 %804  ;;  %904 = vmatpush1.bf16.msra.mxu1 %v898_v45 }
 0x445   : > { %v796_v47 = vsel %vm507_vm4, %v795_v44, 0.0 }
 0x446   : > { %v797_v48 = vrot.slane %v796_v47, 4  ;;  %847 = vmatpush1.bf16.msra.mxu0 %v723_v17 }
 0x447   : > { %848 = vmatprep.subr.bf16.mxu0 %v726_v23 }
 0x448   : > { %v1189_v50 = vpop.eup %1188  ;;  %v798_v51 = vadd.f32 %v797_v48, %v796_v47 }
 0x449   : > { %v650_v54 = vadd.f32 1.0, %v1189_v50 }
 0x44a   : > { %v799_v53 = vrot.slane %v798_v51, 2 }
 0x44b   : > { %1190 = vrcp.f32 %v650_v54 }
 0x44c   : > { %v800_v55 = vadd.f32 %v799_v53, %v798_v51 }
 0x44e   : > { %v801_v58 = vrot.slane %v800_v55, 1 }
 0x450   : > { %v802_v7 = vadd.f32 %v801_v58, %v800_v55  ;;  %v883_v55 = vld [vmem:[%s1492_s10] sm:$0x3] }
 0x451   : > { %v884_v9 = vpack.c.bf16 %v883_v55, %v883_v55 }
 0x452   : > { %v807_v11 = vadd.f32 %v805_v63, %v802_v7 }
 0x454   : > { %v808_v16 = vmax.f32 %v807_v11, 0.0 }
 0x455   : > { %v1191_v20 = vpop.eup %1190 }
 0x456   : > { %v812_v19 = vrot.slane %v808_v16, %v1326_v38  ;;  %v716_v38 = vld [vmem:[%s1487_s5 + $0x70] sm:$0xff] }
 0x457   : > { %v725_v25 = vpack.c.bf16 %v716_v38, %v714_v24 }
 0x458   : > { %814 = vrot.lane.b32.xlu1 %v812_v19, %s1207_s30 }
 0x459   : > { %849 = vmatpush1.bf16.msra.mxu0 %v725_v25 }
 0x45c   : > { %655 = vperm.xlu1 %1181, %v1191_v20  }
 0x47f   : > { %v696_v1 = vpop.f32.mrb[4].mxu0 }
 0x480   : > { %v1158_v26 = vpop.f32.mrb[5].mxu0 }
 0x481   : > { %v699_v27 = vpop.f32.mrb[6].mxu0 }
 0x482   : > { %v1159_v28 = vpop.f32.mrb[7].mxu0 }
 0x4ca   : > { %v815_v29 = vpop.permute.xlu1 %814 }
 0x4cb   : > { %v817_v30 = vmul.f32 %v815_v29, %v1353_v52 }
 0x4cd   : > { %819 = vrot.lane.b32.xlu0 %v817_v30, %s1208_s14 }
 0x4db   : > { %v656_v31 = vpop.permute.xlu1 %655 }
 0x4dc   : > { %v658_v32 = vmul.f32 %v656_v31, %v610_v46 }
 0x4de   : > { %v697_v33 = vadd.f32 %v696_v1, %v658_v32 }
 0x4e0   : > { %v718_v34 = vpack.c.bf16 %v697_v33, %v697_v33 }
 0x4e2   : > { %1125 = vmatmul.mubr.msk.bf16.vlgmr.msra.gmra.mrb[8].mxu0 %vm611_vm5, %v718_v34 }
 0x53f   : > { %v820_v15 = vpop.permute.xlu0 %819 }
 0x540   : > { %v822_v18 = vsel %vm452_vm2, %v820_v15, 0.0 }
 0x541   : > { %823 = vadd.xlane.f32.xlu1 %v822_v18 }
 0x5b5   : > { %v876_v46 = vpop.f32.mrb[8].mxu0 }
 0x5b6   : > { %v878_v43 = vpop.f32.mrb[9].mxu0 }
 0x5b7   : > { %v880_v44 = vpop.f32.mrb[10].mxu0 }
 0x5b8   : > { %v881_v47 = vpop.f32.mrb[11].mxu0 }
 0x5ce   : > { %v824_v48 = vpop.xlane.xlu1 %823 }
 0x5cf   : > { %v825_v50 = vadd.f32 %v824_v48, %v1353_v52 }
 0x5d1   : > { %v1124_v51 = vmul.f32 -1.442695, %v825_v50 }
 0x5d3   : > { %1192 = vpow2.f32 %v1124_v51 }
 0x5dd   : > { %v1193_v53 = vpop.eup %1192 }
 0x5de   : > { %v829_v54 = vadd.f32 1.0, %v1193_v53 }
 0x5e0   : > { %1194 = vrcp.f32 %v829_v54 }
 0x5ea   : > { %v1195_v56 = vpop.eup %1194 }
 0x5eb   : > { %834 = vperm.xlu0 %1182, %v1195_v56  }
 0x5ef   : > { %892 = vrot.lane.b32.xlu0 %v884_v9, %s1211_s23 }
 0x5f0   : > { %1183 = vset.pattern.permute.xlu0 %v1212_v57 }
 0x5f3   : > { %996 = vperm.xlu0 %1183, %v883_v55  }
 0x66a   : > { %v835_v58 = vpop.permute.xlu0 %834 }
 0x66b   : > { %v837_v52 = vmul.f32 %v835_v58, %v789_v36  ;;  %v838_v59 = vmul.f32 %v835_v58, %v790_v37 }
 0x66d   : > { %v877_v60 = vadd.f32 %v876_v46, %v837_v52  ;;  %v879_v61 = vadd.f32 %v878_v43, %v838_v59 }
 0x66e   : > { %v893_v62 = vpop.permute.xlu0 %892 }
 0x66f   : > { %v885_v63 = vpack.c.bf16 %v877_v60, %v877_v60  ;;  %v886_v0 = vpack.c.bf16 %v879_v61, %v879_v61  ;;  %1127 = vmatmul.mubr.msk.bf16.vlgmr.msra.gmra.mrb[8].mxu1 %vm452_vm2, %v893_v62 }
 0x670   : > { %985 = vmatprep.mubr.bf16.mxu1 %v1209_v49 }
 0x671   : > { %1128 = vmatprep.subr.msk.bf16.mxu1 %vm456_vm1, %v886_v0  ;;  %v948_v3 = vsel %vm456_vm1, %v885_v63, 0 }
 0x672   : > { %954 = vmatpush1.bf16.msra.mxu1 %v948_v3  ;;  %v997_v5 = vpop.permute.xlu0 %996 }
 0x677   : > { %1129 = vmatmul.mubr.msk.bf16.vlgmr.msra.gmra.mrb[12].mxu1 %vm452_vm2, %v884_v9 }
 0x742   : > { %v937_v2 = vpop.f32.mrb[8].mxu1 }
 0x743   : > { %v939_v35 = vpop.f32.mrb[9].mxu1 }
 0x744   : > { %v941_v36 = vpop.f32.mrb[10].mxu1 }
 0x745   : > { %v942_v37 = vpop.f32.mrb[11].mxu1 }
 0x74a   : > { %v987_v4 = vpop.f32.mrb[12].mxu1 }
 0x74b   : > { %v988_v6 = vadd.f32 %v987_v4, %v937_v2  ;;  %v989_v7 = vpop.f32.mrb[13].mxu1 }
 0x74c   : > { %v990_v8 = vadd.f32 %v989_v7, %v939_v35  ;;  %v991_v10 = vpop.f32.mrb[14].mxu1 }
 0x74d   : > { %v999_v11 = vadd.f32 %v997_v5, %v988_v6  ;;  %v992_v49 = vpop.f32.mrb[15].mxu1 }
 0x74e   : > { %v1000_v12 = vadd.f32 %v997_v5, %v990_v8 }
 0x750   : > { %v1003_v13 = vcombine.low %v999_v11, %v1000_v12 }
 0x752   : > { %1130 = vst.sshfl [vmem:[%s440_s27] sm:$0x33 pattern:$0x76325410] %v1003_v13 }
 0x753 PF: > { %s21_s17 = sadd.s32 1, %s1202_s17  }
 0x754   : > { %p18_p4 = scmp.ge.s32.totalorder %s21_s17, 4  }
 0x756   :  { %20 = sbr.rel (!%p18_p4) target bundleno = 1 (0x1), region = 103 }

</bundles_post_ra>
